<compile_context>
chip_gen: v5e
topology: v5e:2x2
jax: 0.10.0
libtpu: 0.0.40
codegen_flags: <defaults>
</compile_context>

<pallas_src>
import functools

import jax
import jax.numpy as jnp
from jax.experimental import pallas as pl
from jax.experimental.pallas import tpu as pltpu

THRESHOLD = 1.0
IN_DIM, H1_DIM, H2_DIM, OUT_DIM = 28 * 28, 128, 64, 10


def snn_kernel(x_ref, w1_ref, b1_ref, w2_ref, b2_ref, w3_ref, b3_ref, out_ref):
    # x_ref: (TB, 784) f32; weights bf16; biases f32; out (TB, 10) f32.
    # Cast the streamed x tile to bf16 in-kernel (VMEM-resident, free vs. a separate HBM pass).
    x = x_ref[...].astype(jnp.bfloat16)

    # fc1 (MXU, bf16 operands, f32 accumulate) + LIF spike 1 (f32 compare, bf16 spikes)
    h1 = jnp.dot(x, w1_ref[...], preferred_element_type=jnp.float32) + b1_ref[...]
    z1 = (h1 > THRESHOLD).astype(jnp.bfloat16)                       # (TB, 128)

    # fc2 + LIF spike 2
    h2 = jnp.dot(z1, w2_ref[...], preferred_element_type=jnp.float32) + b2_ref[...]
    z2 = (h2 > THRESHOLD).astype(jnp.bfloat16)                       # (TB, 64)

    # fc3 (logits, f32)
    out_ref[...] = (
        jnp.dot(z2, w3_ref[...], preferred_element_type=jnp.float32) + b3_ref[...]
    )                                                                # (TB, 10)


def _round_up(n, m):
    return (n + m - 1) // m * m


@functools.partial(jax.jit, static_argnames=("tb",))
def snn_forward(x_nchw, params, *, tb=1024):
    """x_nchw: (B, 1, 28, 28) float-ish. Returns logits (B, 10) float32."""
    B = x_nchw.shape[0]
    # torch .view(-1, 784); keep f32 — the bf16 cast happens inside the kernel.
    x = x_nchw.reshape(B, IN_DIM).astype(jnp.float32)
    w1, b1, w2, b2, w3, b3 = params
    w1 = w1.astype(jnp.bfloat16)
    w2 = w2.astype(jnp.bfloat16)
    w3 = w3.astype(jnp.bfloat16)
    b1 = b1.astype(jnp.float32)
    b2 = b2.astype(jnp.float32)
    b3 = b3.astype(jnp.float32)

    # Batch tile: multiple of 8 (f32 sublane), capped at `tb`. No padding of x — Pallas handles
    # the ragged last block (padded reads, masked writes).
    tb_eff = min(tb, _round_up(B, 8))
    grid = (pl.cdiv(B, tb_eff),)

    const = lambda i: (0, 0)   # weights/biases: same block every step -> resident in VMEM
    in_specs = [
        pl.BlockSpec((tb_eff, IN_DIM), lambda i: (i, 0)),   # x tile, pipelined over batch
        pl.BlockSpec((IN_DIM, H1_DIM), const),              # W1
        pl.BlockSpec((1, H1_DIM), const),                   # b1
        pl.BlockSpec((H1_DIM, H2_DIM), const),              # W2
        pl.BlockSpec((1, H2_DIM), const),                   # b2
        pl.BlockSpec((H2_DIM, OUT_DIM), const),             # W3
        pl.BlockSpec((1, OUT_DIM), const),                  # b3
    ]
    out_specs = pl.BlockSpec((tb_eff, OUT_DIM), lambda i: (i, 0))

    flops = 2 * B * (IN_DIM * H1_DIM + H1_DIM * H2_DIM + H2_DIM * OUT_DIM)
    bytes_accessed = (
        B * IN_DIM * 4                                                # x (f32, read once)
        + (IN_DIM * H1_DIM + H1_DIM * H2_DIM + H2_DIM * OUT_DIM) * 2  # weights (bf16)
        + (H1_DIM + H2_DIM + OUT_DIM) * 4                             # biases (f32)
        + B * OUT_DIM * 4                                             # logits (f32)
    )

    out = pl.pallas_call(
        snn_kernel,
        out_shape=jax.ShapeDtypeStruct((B, OUT_DIM), jnp.float32),
        grid=grid,
        in_specs=in_specs,
        out_specs=out_specs,
        compiler_params=pltpu.CompilerParams(
            dimension_semantics=("parallel",),   # v7x: shard batch steps across both TCs
        ),
        cost_estimate=pl.CostEstimate(
            flops=flops, transcendentals=0, bytes_accessed=bytes_accessed
        ),
    )(x, w1, b1, w2, b2, w3, b3)
    return out


def init_params(key):
    """Deterministic init mimicking nn.Linear default: U(-1/sqrt(fan_in), 1/sqrt(fan_in)).
    Weights stored pre-transposed as (fan_in, fan_out) for x @ W; biases as (1, fan_out)."""
    def linear(key, fan_in, fan_out):
        kw, kb = jax.random.split(key)
        bound = 1.0 / jnp.sqrt(fan_in)
        w = jax.random.uniform(kw, (fan_in, fan_out), jnp.float32, -bound, bound)
        b = jax.random.uniform(kb, (1, fan_out), jnp.float32, -bound, bound)
        return w, b

    k1, k2, k3 = jax.random.split(key, 3)
    w1, b1 = linear(k1, IN_DIM, H1_DIM)
    w2, b2 = linear(k2, H1_DIM, H2_DIM)
    w3, b3 = linear(k3, H2_DIM, OUT_DIM)
    return (w1, b1, w2, b2, w3, b3)


def ref_forward(x_nchw, params):
    """Pure-JAX reference mirroring the kernel's bf16 weight/activation path."""
    B = x_nchw.shape[0]
    xf = x_nchw.reshape(B, IN_DIM).astype(jnp.float32).astype(jnp.bfloat16)
    w1, b1, w2, b2, w3, b3 = params
    w1, w2, w3 = (w.astype(jnp.bfloat16) for w in (w1, w2, w3))
    h1 = jnp.dot(xf, w1, preferred_element_type=jnp.float32) + b1
    z1 = (h1 > THRESHOLD).astype(jnp.bfloat16)
    h2 = jnp.dot(z1, w2, preferred_element_type=jnp.float32) + b2
    z2 = (h2 > THRESHOLD).astype(jnp.bfloat16)
    return jnp.dot(z2, w3, preferred_element_type=jnp.float32) + b3


if __name__ == "__main__":
    key = jax.random.PRNGKey(0)
    kx, kp, kx2 = jax.random.split(key, 3)
    params = init_params(kp)

    # Small MNIST-shaped batch (single grid step, tb_eff clamps to 8).
    B = 8
    x = jax.random.normal(kx, (B, 1, 28, 28), jnp.float32)
    logits = snn_forward(x, params)
    jax.block_until_ready(logits)
    ref = ref_forward(x, params)
    assert logits.shape == (B, 10)
    assert jnp.allclose(logits, ref, atol=1e-2, rtol=1e-2)

    # Ragged batch with a small tile to exercise a multi-step grid with a masked last block
    # (no jnp.pad; grid = cdiv(40, 16) = 3, last block rows 32..47 masked on writeback).
    B2 = 40
    x2 = jax.random.normal(kx2, (B2, 1, 28, 28), jnp.float32)
    logits2 = snn_forward(x2, params, tb=16)
    jax.block_until_ready(logits2)
    ref2 = ref_forward(x2, params)
    assert logits2.shape == (B2, 10)
    assert jnp.allclose(logits2, ref2, atol=1e-2, rtol=1e-2)

    print("KERNEL_OK")
</pallas_src>

<mosaic_0001>
module attributes {stable_mosaic.version = 11 : i64} {
  func.func @snn_kernel(%arg0: i32, %arg1: memref<8x784xf32, #tpu.memory_space<vmem>>, %arg2: memref<784x128xbf16, #tpu.memory_space<vmem>>, %arg3: memref<1x128xf32, #tpu.memory_space<vmem>>, %arg4: memref<128x64xbf16, #tpu.memory_space<vmem>>, %arg5: memref<1x64xf32, #tpu.memory_space<vmem>>, %arg6: memref<64x10xbf16, #tpu.memory_space<vmem>>, %arg7: memref<1x10xf32, #tpu.memory_space<vmem>>, %arg8: memref<8x10xf32, #tpu.memory_space<vmem>>) attributes {dimension_semantics = [#tpu.dimension_semantics<parallel>], iteration_bounds = array<i64: 1>, scalar_prefetch = 0 : i64, scratch_operands = 0 : i64, tpu.core_type = #tpu.core_type<tc>, window_params = [{transform_indices = @transform_0, window_bounds = array<i64: 8, 784>}, {pipeline_mode = #tpu.pipeline_mode<synchronous>, transform_indices = @transform_1, window_bounds = array<i64: 784, 128>}, {pipeline_mode = #tpu.pipeline_mode<synchronous>, transform_indices = @transform_2, window_bounds = array<i64: 1, 128>}, {pipeline_mode = #tpu.pipeline_mode<synchronous>, transform_indices = @transform_3, window_bounds = array<i64: 128, 64>}, {pipeline_mode = #tpu.pipeline_mode<synchronous>, transform_indices = @transform_4, window_bounds = array<i64: 1, 64>}, {pipeline_mode = #tpu.pipeline_mode<synchronous>, transform_indices = @transform_5, window_bounds = array<i64: 64, 10>}, {pipeline_mode = #tpu.pipeline_mode<synchronous>, transform_indices = @transform_6, window_bounds = array<i64: 1, 10>}, {transform_indices = @transform_7, window_bounds = array<i64: 8, 10>}]} {
    %c0 = arith.constant 0 : index
    %c0_0 = arith.constant 0 : index
    %0 = vector.load %arg1[%c0, %c0_0] : memref<8x784xf32, #tpu.memory_space<vmem>>, vector<8x784xf32>
    %1 = arith.truncf %0 : vector<8x784xf32> to vector<8x784xbf16>
    %c0_1 = arith.constant 0 : index
    %c0_2 = arith.constant 0 : index
    %2 = vector.load %arg2[%c0_1, %c0_2] : memref<784x128xbf16, #tpu.memory_space<vmem>>, vector<784x128xbf16>
    %cst = arith.constant dense<0.000000e+00> : vector<8x128xf32>
    %3 = tpu.matmul %1, %2, %cst {dimension_numbers = #tpu.dot_dimension_numbers<[1], [0], [0], [1], [0, 0, 1, 1], [], []>} : vector<8x784xbf16>, vector<784x128xbf16>, vector<8x128xf32> -> vector<8x128xf32>
    %c0_3 = arith.constant 0 : index
    %c0_4 = arith.constant 0 : index
    %4 = vector.load %arg3[%c0_3, %c0_4] : memref<1x128xf32, #tpu.memory_space<vmem>>, vector<1x128xf32>
    %5 = vector.broadcast %4 : vector<1x128xf32> to vector<8x128xf32>
    %6 = arith.addf %3, %5 : vector<8x128xf32>
    %cst_5 = arith.constant 1.000000e+00 : f32
    %7 = vector.broadcast %cst_5 : f32 to vector<8x128xf32>
    %8 = arith.cmpf ogt, %6, %7 : vector<8x128xf32>
    %9 = arith.extui %8 : vector<8x128xi1> to vector<8x128xi32>
    %10 = arith.sitofp %9 : vector<8x128xi32> to vector<8x128xf32>
    %11 = arith.truncf %10 : vector<8x128xf32> to vector<8x128xbf16>
    %c0_6 = arith.constant 0 : index
    %c0_7 = arith.constant 0 : index
    %12 = vector.load %arg4[%c0_6, %c0_7] : memref<128x64xbf16, #tpu.memory_space<vmem>>, vector<128x64xbf16>
    %cst_8 = arith.constant dense<0.000000e+00> : vector<8x64xf32>
    %13 = tpu.matmul %11, %12, %cst_8 {dimension_numbers = #tpu.dot_dimension_numbers<[1], [0], [0], [1], [0, 0, 1, 1], [], []>} : vector<8x128xbf16>, vector<128x64xbf16>, vector<8x64xf32> -> vector<8x64xf32>
    %c0_9 = arith.constant 0 : index
    %c0_10 = arith.constant 0 : index
    %14 = vector.load %arg5[%c0_9, %c0_10] : memref<1x64xf32, #tpu.memory_space<vmem>>, vector<1x64xf32>
    %15 = vector.broadcast %14 : vector<1x64xf32> to vector<8x64xf32>
    %16 = arith.addf %13, %15 : vector<8x64xf32>
    %cst_11 = arith.constant 1.000000e+00 : f32
    %17 = vector.broadcast %cst_11 : f32 to vector<8x64xf32>
    %18 = arith.cmpf ogt, %16, %17 : vector<8x64xf32>
    %19 = arith.extui %18 : vector<8x64xi1> to vector<8x64xi32>
    %20 = arith.sitofp %19 : vector<8x64xi32> to vector<8x64xf32>
    %21 = arith.truncf %20 : vector<8x64xf32> to vector<8x64xbf16>
    %c0_12 = arith.constant 0 : index
    %c0_13 = arith.constant 0 : index
    %22 = vector.load %arg6[%c0_12, %c0_13] : memref<64x10xbf16, #tpu.memory_space<vmem>>, vector<64x10xbf16>
    %cst_14 = arith.constant dense<0.000000e+00> : vector<8x10xf32>
    %23 = tpu.matmul %21, %22, %cst_14 {dimension_numbers = #tpu.dot_dimension_numbers<[1], [0], [0], [1], [0, 0, 1, 1], [], []>} : vector<8x64xbf16>, vector<64x10xbf16>, vector<8x10xf32> -> vector<8x10xf32>
    %c0_15 = arith.constant 0 : index
    %c0_16 = arith.constant 0 : index
    %24 = vector.load %arg7[%c0_15, %c0_16] : memref<1x10xf32, #tpu.memory_space<vmem>>, vector<1x10xf32>
    %25 = vector.broadcast %24 : vector<1x10xf32> to vector<8x10xf32>
    %26 = arith.addf %23, %25 : vector<8x10xf32>
    %c0_17 = arith.constant 0 : index
    %c0_18 = arith.constant 0 : index
    %27 = vector.load %arg8[%c0_17, %c0_18] : memref<8x10xf32, #tpu.memory_space<vmem>>, vector<8x10xf32>
    tpu.vector_store %arg8[%c0_17, %c0_18], %26 {strides = array<i32>} : memref<8x10xf32, #tpu.memory_space<vmem>>, vector<8x10xf32>,
    return
  }
  func.func @transform_0(%arg0: i32) -> (i32, i32) {
    %c0_i32 = arith.constant 0 : i32
    %c0_i32_0 = arith.constant 0 : i32
    return %arg0, %c0_i32 : i32, i32
  }
  func.func @transform_1(%arg0: i32) -> (i32, i32) {
    %c0_i32 = arith.constant 0 : i32
    %c0_i32_0 = arith.constant 0 : i32
    %c0_i32_1 = arith.constant 0 : i32
    return %c0_i32, %c0_i32_0 : i32, i32
  }
  func.func @transform_2(%arg0: i32) -> (i32, i32) {
    %c0_i32 = arith.constant 0 : i32
    %c0_i32_0 = arith.constant 0 : i32
    %c0_i32_1 = arith.constant 0 : i32
    return %c0_i32, %c0_i32_0 : i32, i32
  }
  func.func @transform_3(%arg0: i32) -> (i32, i32) {
    %c0_i32 = arith.constant 0 : i32
    %c0_i32_0 = arith.constant 0 : i32
    %c0_i32_1 = arith.constant 0 : i32
    return %c0_i32, %c0_i32_0 : i32, i32
  }
  func.func @transform_4(%arg0: i32) -> (i32, i32) {
    %c0_i32 = arith.constant 0 : i32
    %c0_i32_0 = arith.constant 0 : i32
    %c0_i32_1 = arith.constant 0 : i32
    return %c0_i32, %c0_i32_0 : i32, i32
  }
  func.func @transform_5(%arg0: i32) -> (i32, i32) {
    %c0_i32 = arith.constant 0 : i32
    %c0_i32_0 = arith.constant 0 : i32
    %c0_i32_1 = arith.constant 0 : i32
    return %c0_i32, %c0_i32_0 : i32, i32
  }
  func.func @transform_6(%arg0: i32) -> (i32, i32) {
    %c0_i32 = arith.constant 0 : i32
    %c0_i32_0 = arith.constant 0 : i32
    %c0_i32_1 = arith.constant 0 : i32
    return %c0_i32, %c0_i32_0 : i32, i32
  }
  func.func @transform_7(%arg0: i32) -> (i32, i32) {
    %c0_i32 = arith.constant 0 : i32
    %c0_i32_0 = arith.constant 0 : i32
    return %arg0, %c0_i32 : i32, i32
  }
}

</mosaic_0001>

<bundles_post_ra>
// kernel: snn_forward.1
= control target key start
LH: loop header
LB: loop body
LE: loop exit
PB: predicated region body
PF: predicated region fallthrough
CT: control target
= control target key end

     0   :  { %s1295_s0 = inlined_call_operand.vmem [shape: f32[8,784], index: 0, kind: input, shape index: {}]   ;;  %s1296_s1 = inlined_call_operand.vmem [shape: bf16[784,128], index: 1, kind: input, shape index: {}]   ;;  %s1297_s2 = inlined_call_operand.vmem [shape: f32[1,128], index: 2, kind: input, shape index: {}]   ;;  %s1298_s3 = inlined_call_operand.vmem [shape: bf16[128,64], index: 3, kind: input, shape index: {}]   ;;  %s1299_s4 = inlined_call_operand.vmem [shape: f32[1,64], index: 4, kind: input, shape index: {}]   ;;  %s1300_s5 = inlined_call_operand.vmem [shape: bf16[64,10], index: 5, kind: input, shape index: {}]   ;;  %s1301_s6 = inlined_call_operand.vmem [shape: f32[1,10], index: 6, kind: input, shape index: {}]   ;;  %s1302_s7 = inlined_call_operand.hbm [shape: f32[8,10], index: 7, kind: output, shape index: {}]  }
   0x1   :  { %v950_v0 = vld [vmem:[%s1296_s1 + $0x38] sm:$0xff]  ;;  %v949_v3 = vld [vmem:[%s1296_s1 + $0x30] sm:$0xff]  ;;  %v948_v8 = vld [vmem:[%s1296_s1 + $0x28] sm:$0xff] }
   0x2   :  { %v958_v1 = vld [vmem:[%s1296_s1 + $0x78] sm:$0xff]  ;;  %442 = vmatpush.bf16.msra.mxu0 %v950_v0  ;;  %v957_v4 = vld [vmem:[%s1296_s1 + $0x70] sm:$0xff]  ;;  %v956_v9 = vld [vmem:[%s1296_s1 + $0x68] sm:$0xff] }
   0x3   :  { %v966_v2 = vld [vmem:[%s1296_s1 + $0xb8] sm:$0xff]  ;;  %455 = vmatpush.bf16.msra.mxu1 %v958_v1  ;;  %v965_v5 = vld [vmem:[%s1296_s1 + $0xb0] sm:$0xff]  ;;  %v964_v10 = vld [vmem:[%s1296_s1 + $0xa8] sm:$0xff] }
   0x4   :  { %468 = vmatpush.bf16.msra.mxu2 %v966_v2  ;;  %v974_v6 = vld [vmem:[%s1296_s1 + $0xf8] sm:$0xff]  ;;  %v973_v7 = vld [vmem:[%s1296_s1 + $0xf0] sm:$0xff]  ;;  %v972_v11 = vld [vmem:[%s1296_s1 + $0xe8] sm:$0xff] }
   0x5   :  { %481 = vmatpush.bf16.msra.mxu3 %v974_v6  ;;  %v947_v12 = vld [vmem:[%s1296_s1 + $0x20] sm:$0xff]  ;;  %v946_v16 = vld [vmem:[%s1296_s1 + $0x18] sm:$0xff] }
   0x6   :  { %443 = vmatpush.bf16.msra.mxu0 %v949_v3  ;;  %v955_v13 = vld [vmem:[%s1296_s1 + $0x60] sm:$0xff]  ;;  %v954_v17 = vld [vmem:[%s1296_s1 + $0x58] sm:$0xff] }
   0x7   :  { %456 = vmatpush.bf16.msra.mxu1 %v957_v4  ;;  %v963_v14 = vld [vmem:[%s1296_s1 + $0xa0] sm:$0xff]  ;;  %v962_v18 = vld [vmem:[%s1296_s1 + $0x98] sm:$0xff] }
   0x8   :  { %469 = vmatpush.bf16.msra.mxu2 %v965_v5  ;;  %v971_v15 = vld [vmem:[%s1296_s1 + $0xe0] sm:$0xff]  ;;  %v970_v19 = vld [vmem:[%s1296_s1 + $0xd8] sm:$0xff] }
   0x9   :  { %482 = vmatpush.bf16.msra.mxu3 %v973_v7 }
   0xa   :  { %444 = vmatpush.bf16.msra.mxu0 %v948_v8 }
   0xb   :  { %457 = vmatpush.bf16.msra.mxu1 %v956_v9 }
   0xc   :  { %470 = vmatpush.bf16.msra.mxu2 %v964_v10 }
   0xd   :  { %483 = vmatpush.bf16.msra.mxu3 %v972_v11 }
   0xe   :  { %445 = vmatpush.bf16.msra.mxu0 %v947_v12 }
   0xf   :  { %458 = vmatpush.bf16.msra.mxu1 %v955_v13 }
  0x10   :  { %471 = vmatpush.bf16.msra.mxu2 %v963_v14 }
  0x11   :  { %484 = vmatpush.bf16.msra.mxu3 %v971_v15 }
  0x12   :  { %12 = vsyncpa [#allocation3], 0  ;;  %446 = vmatpush.bf16.msra.mxu0 %v946_v16  ;;  %v945_v20 = vld [vmem:[%s1296_s1 + $0x10] sm:$0xff]  ;;  %v944_v24 = vld [vmem:[%s1296_s1 + $0x8] sm:$0xff]  ;;  %vm438_vm0 = vcmask 130048   ;;  %vm658_vm4 = vcmask 523264  }
  0x13   :  { %459 = vmatpush.bf16.msra.mxu1 %v954_v17  ;;  %v953_v21 = vld [vmem:[%s1296_s1 + $0x50] sm:$0xff]  ;;  %v952_v25 = vld [vmem:[%s1296_s1 + $0x48] sm:$0xff]  ;;  %v943_v27 = vld [vmem:[%s1296_s1] sm:$0xff]  ;;  %s1038_s23 = smov [#allocation2]   ;;  %vm675_vm5 = vcmask 80896  }
  0x14   :  { %472 = vmatpush.bf16.msra.mxu2 %v962_v18  ;;  %v961_v22 = vld [vmem:[%s1296_s1 + $0x90] sm:$0xff]  ;;  %v960_v26 = vld [vmem:[%s1296_s1 + $0x88] sm:$0xff]  ;;  %v951_v29 = vld [vmem:[%s1296_s1 + $0x40] sm:$0xff] }
  0x15   :  { %485 = vmatpush.bf16.msra.mxu3 %v970_v19  ;;  %v969_v23 = vld [vmem:[%s1296_s1 + $0xd0] sm:$0xff]  ;;  %v968_v28 = vld [vmem:[%s1296_s1 + $0xc8] sm:$0xff]  ;;  %v28_v30 = vld [vmem:[%s1295_s0] sm:$0xff] }
  0x16   :  { %447 = vmatpush.bf16.msra.mxu0 %v945_v20  ;;  %v29_v31 = vld [vmem:[%s1295_s0 + $0x8] sm:$0xff]  ;;  %v982_v32 = vld [vmem:[%s1296_s1 + $0x138] sm:$0xff]  ;;  %v959_v34 = vld [vmem:[%s1296_s1 + $0x80] sm:$0xff]  ;;  %v35_v36 = vpack.c.bf16 %v28_v30, %v28_v30 }
  0x17   :  { %460 = vmatpush.bf16.msra.mxu1 %v953_v21  ;;  %v990_v33 = vld [vmem:[%s1296_s1 + $0x178] sm:$0xff]  ;;  %v30_v35 = vld [vmem:[%s1295_s0 + $0x10] sm:$0xff]  ;;  %v36_v37 = vpack.c.bf16 %v29_v31, %v29_v31  ;;  %v967_v38 = vld [vmem:[%s1296_s1 + $0xc0] sm:$0xff] }
  0x18   :  { %473 = vmatpush.bf16.msra.mxu2 %v961_v22  ;;  %v991_v39 = vld [vmem:[%s1296_s1 + $0x180] sm:$0xff]  ;;  %v31_v40 = vld [vmem:[%s1295_s0 + $0x18] sm:$0xff]  ;;  %v981_v41 = vld [vmem:[%s1296_s1 + $0x130] sm:$0xff]  ;;  %v37_v43 = vpack.c.bf16 %v30_v35, %v30_v35 }
  0x19   :  { %486 = vmatpush.bf16.msra.mxu3 %v969_v23  ;;  %v989_v42 = vld [vmem:[%s1296_s1 + $0x170] sm:$0xff]  ;;  %v38_v44 = vpack.c.bf16 %v31_v40, %v31_v40  ;;  %v980_v45 = vld [vmem:[%s1296_s1 + $0x128] sm:$0xff]  ;;  %v979_v47 = vld [vmem:[%s1296_s1 + $0x120] sm:$0xff] }
  0x1a   :  { %448 = vmatpush.bf16.msra.mxu0 %v944_v24  ;;  %v988_v46 = vld [vmem:[%s1296_s1 + $0x168] sm:$0xff]  ;;  %v987_v48 = vld [vmem:[%s1296_s1 + $0x160] sm:$0xff]  ;;  %v978_v49 = vld [vmem:[%s1296_s1 + $0x118] sm:$0xff] }
  0x1b   :  { %461 = vmatpush.bf16.msra.mxu1 %v952_v25  ;;  %v986_v50 = vld [vmem:[%s1296_s1 + $0x158] sm:$0xff]  ;;  %v34_v51 = vld [vmem:[%s1295_s0 + $0x30] sm:$0xff]  ;;  %v976_v55 = vld [vmem:[%s1296_s1 + $0x108] sm:$0xff] }
  0x1c   :  { %474 = vmatpush.bf16.msra.mxu2 %v960_v26  ;;  %v977_v52 = vld [vmem:[%s1296_s1 + $0x110] sm:$0xff]  ;;  %v41_v54 = vpack.c.bf16 %v34_v51, %v34_v51  ;;  %v984_v56 = vld [vmem:[%s1296_s1 + $0x148] sm:$0xff]  ;;  %v975_v57 = vld [vmem:[%s1296_s1 + $0x100] sm:$0xff] }
  0x1d   :  { %487 = vmatpush.bf16.msra.mxu3 %v968_v28  ;;  %v985_v53 = vld [vmem:[%s1296_s1 + $0x150] sm:$0xff]  ;;  %v983_v58 = vld [vmem:[%s1296_s1 + $0x140] sm:$0xff]  ;;  %v33_v60 = vld [vmem:[%s1295_s0 + $0x28] sm:$0xff] }
  0x1e   :  { %449 = vmatpush.bf16.msra.mxu0 %v943_v27  ;;  %v32_v59 = vld [vmem:[%s1295_s0 + $0x20] sm:$0xff]  ;;  %v40_v62 = vpack.c.bf16 %v33_v60, %v33_v60  ;;  %v999_v63 = vld [vmem:[%s1298_s3 + $0x38] sm:$0xff]  ;;  %v998_v0 = vld [vmem:[%s1298_s3 + $0x30] sm:$0xff]  ;;  %s684_s0 = sshll.u32 %s1302_s7, 4  ;;  %s685_s0 = int_to_ptr.hbm [resolvable:$true] %s684_s0 }
  0x1f   :  { %462 = vmatpush.bf16.msra.mxu1 %v951_v29  ;;  %v39_v61 = vpack.c.bf16 %v32_v59, %v32_v59  ;;  %v997_v1 = vld [vmem:[%s1298_s3 + $0x28] sm:$0xff]  ;;  %v996_v2 = vld [vmem:[%s1298_s3 + $0x20] sm:$0xff]  ;;  %v995_v3 = vld [vmem:[%s1298_s3 + $0x18] sm:$0xff] }
  0x20   :  { %475 = vmatpush.bf16.msra.mxu2 %v959_v34  ;;  %v994_v4 = vld [vmem:[%s1298_s3 + $0x10] sm:$0xff]  ;;  %v993_v5 = vld [vmem:[%s1298_s3 + $0x8] sm:$0xff]  ;;  %v992_v8 = vld [vmem:[%s1298_s3] sm:$0xff] }
  0x21   :  { %450 = vmatmul.bf16.vlgmr.msra.gmra.mxu0 %v35_v36  ;;  %488 = vmatpush.bf16.msra.mxu3 %v967_v38  ;;  %v1003_v9 = vld [vmem:[%s1300_s5 + $0x18] sm:$0xff]  ;;  %v1002_v12 = vld [vmem:[%s1300_s5 + $0x10] sm:$0xff]  ;;  %v1007_v15 = vld [vmem:[%s1297_s2] ss:$0 sm:$0xff] }
  0x22   :  { %494 = vmatpush.bf16.msrb.mxu0 %v982_v32  ;;  %463 = vmatmul.bf16.vlgmr.msra.gmra.mxu1 %v36_v37  ;;  %v1001_v16 = vld [vmem:[%s1300_s5 + $0x8] sm:$0xff]  ;;  %v1036_v32 = vmov 1.0|1.0   ;;  %v1008_v34 = vld [vmem:[%s1299_s4] ss:$0 sm:$0xff]  ;;  %v1037_v37 = vmov 0.0  }
  0x23   :  { %507 = vmatpush.bf16.msrb.mxu1 %v990_v33  ;;  %476 = vmatmul.bf16.vlgmr.msra.gmra.mxu2 %v37_v43  ;;  %v1000_v33 = vld [vmem:[%s1300_s5] sm:$0xff]  ;;  %s682_s5 = sshll.u32 %s1038_s23, 4  ;;  %s683_s5 = int_to_ptr.vmem [resolvable:$true] %s682_s5 }
  0x24   :  { %527 = vmatpush.bf16.msrb.mxu2 %v991_v39  ;;  %489 = vmatmul.bf16.vlgmr.msra.gmra.mxu3 %v38_v44 }
  0x25   :  { %605 = vmatpush.bf16.msrb.mxu3 %v999_v63 }
  0x26   :  { %495 = vmatpush.bf16.msrb.mxu0 %v981_v41  ;;  %v1009_v41 = vld [vmem:[%s1301_s6] ss:$0 sm:$0xff] }
  0x27   :  { %508 = vmatpush.bf16.msrb.mxu1 %v989_v42 }
  0x28   :  { %666 = vmatpush.bf16.msra.mxu2 %v1003_v9 }
  0x29   :  { %606 = vmatpush.bf16.msrb.mxu3 %v998_v0 }
  0x2a   :  { %496 = vmatpush.bf16.msrb.mxu0 %v980_v45 }
  0x2b   :  { %509 = vmatpush.bf16.msrb.mxu1 %v988_v46 }
  0x2c   :  { %667 = vmatpush.bf16.msra.mxu2 %v1002_v12 }
  0x2d   :  { %607 = vmatpush.bf16.msrb.mxu3 %v997_v1 }
  0x2e   :  { %497 = vmatpush.bf16.msrb.mxu0 %v979_v47 }
  0x2f   :  { %510 = vmatpush.bf16.msrb.mxu1 %v987_v48 }
  0x30   :  { %668 = vmatpush.bf16.msra.mxu2 %v1001_v16 }
  0x31   :  { %608 = vmatpush.bf16.msrb.mxu3 %v996_v2 }
  0x32   :  { %498 = vmatpush.bf16.msrb.mxu0 %v978_v49 }
  0x33   :  { %511 = vmatpush.bf16.msrb.mxu1 %v986_v50  ;;  %889 = vmatmul.msk.bf16.vlgmr.msrb.gmra.mxu2 %vm438_vm0, %v41_v54 }
  0x34   :  { %669 = vmatpush.bf16.msra.mxu2 %v1000_v33 }
  0x35   :  { %609 = vmatpush.bf16.msrb.mxu3 %v995_v3 }
  0x36   :  { %499 = vmatpush.bf16.msrb.mxu0 %v977_v52 }
  0x37   :  { %512 = vmatpush.bf16.msrb.mxu1 %v985_v53 }
  0x39   :  { %610 = vmatpush.bf16.msrb.mxu3 %v994_v4 }
  0x3a   :  { %500 = vmatpush.bf16.msrb.mxu0 %v976_v55 }
  0x3b   :  { %513 = vmatpush.bf16.msrb.mxu1 %v984_v56 }
  0x3d   :  { %611 = vmatpush.bf16.msrb.mxu3 %v993_v5 }
  0x3e   :  { %501 = vmatpush.bf16.msrb.mxu0 %v975_v57 }
  0x3f   :  { %514 = vmatpush.bf16.msrb.mxu1 %v983_v58 }
  0x41   :  { %502 = vmatmul.bf16.vlgmr.msrb.gmra.mxu0 %v39_v61  ;;  %612 = vmatpush.bf16.msrb.mxu3 %v992_v8 }
  0x42   :  { %515 = vmatmul.bf16.vlgmr.msrb.gmra.mxu1 %v40_v62 }
  0x9e   :  { %v451_v6 = vpop.f32.mrf.mxu0 }
  0x9f   :  { %v464_v7 = vpop.f32.mrf.mxu1  ;;  %v452_v17 = vadd.f32 %v1007_v15, %v451_v6 }
  0xa1   :  { %v465_v20 = vadd.f32 %v464_v7, %v452_v17 }
  0xa6   :  { %v453_v10 = vpop.f32.mrf.mxu0  ;;  %v477_v13 = vpop.f32.mrf.mxu2 }
  0xa7   :  { %v466_v11 = vpop.f32.mrf.mxu1  ;;  %v490_v14 = vpop.f32.mrf.mxu3  ;;  %v478_v21 = vadd.f32 %v477_v13, %v465_v20 }
  0xa9   :  { %v491_v23 = vadd.f32 %v490_v14, %v478_v21 }
  0xae   :  { %v479_v18 = vpop.f32.mrf.mxu2 }
  0xaf   :  { %v492_v19 = vpop.f32.mrf.mxu3 }
  0xb6   :  { %v529_v22 = vpop.f32.mrf.mxu2 }
  0xbe   :  { %v503_v24 = vpop.f32.mrf.mxu0  ;;  %v531_v28 = vpop.f32.mrf.mxu2 }
  0xbf   :  { %v516_v25 = vpop.f32.mrf.mxu1  ;;  %v504_v26 = vadd.f32 %v503_v24, %v491_v23 }
  0xc1   :  { %v517_v27 = vadd.f32 %v516_v25, %v504_v26 }
  0xc3   :  { %v530_v29 = vadd.f32 %v529_v22, %v517_v27 }
  0xc5   :  { %vm533_vm1 = vcmp.gt.f32.partialorder %v530_v29, 1.0 }
  0xc6   :  { %vm923_vm2 = vmpackc.low %vm533_vm1, %vm533_vm1  ;;  %v505_v30 = vpop.f32.mrf.mxu0 }
  0xc7   :  { %v518_v31 = vpop.f32.mrf.mxu1  ;;  %924 = vmatmul.msk.bf16.vlgmr.msrb.gmra.mxu3 %vm923_vm2, %v1036_v32 }
 0x14a   :  { %v614_v35 = vpop.f32.mrf.mxu3 }
 0x14b   :  { %v615_v36 = vadd.f32 %v1008_v34, %v614_v35 }
 0x14d   :  { %vm618_vm3 = vcmp.gt.f32.partialorder %v615_v36, 1.0 }
 0x14e   :  { %v925_v38 = vsel %vm618_vm3, 1.0, %v1037_v37 }
 0x14f   :  { %v621_v39 = vpack.c.bf16 %v925_v38, %v925_v38 }
 0x151   :  { %942 = vmatmul.msk.bf16.vlgmr.msra.gmra.mxu2 %vm658_vm4, %v621_v39 }
 0x152   :  { %v616_v40 = vpop.f32.mrf.mxu3 }
 0x1d4   :  { %v671_v42 = vpop.f32.mrf.mxu2 }
 0x1d5   :  { %v672_v43 = vadd.f32 %v1009_v41, %v671_v42 }
 0x1d7   :  { %676 = vst.msk [vmem:[#allocation2] sm:$0xff] %vm675_vm5, %v672_v43 }
 0x1d8   :  { %687 = dma.vmem_to_hbm [thread:$0]  %s683_s5, 128, %s685_s0, [#allocation3]  }
 0x1dc   :  { %v673_v44 = vpop.f32.mrf.mxu2 }
 0x1dd   :  { %1034 = dma.done.wait [#allocation3], 128  }
 0x1de   :  { %1035 = vsyncadd [#allocation3], 4294967168 }
 0x1df   :  { %692 = vsyncpa [#allocation3], 1 }

</bundles_post_ra>
